<compile_context>
chip_gen: v7x
topology: tpu7x:2x2x1
jax: 0.10.0
libtpu: 0.0.40
codegen_flags: <defaults>
</compile_context>

<pallas_src>
import jax
import jax.numpy as jnp
from jax import lax
from jax.experimental import pallas as pl
from jax.experimental.pallas import tpu as pltpu


def _round_up(n, m):
    return ((n + m - 1) // m) * m


def _physical_vmem_bytes():
    """Per-core physical VMEM; conservative (v7x) fallback if the query fails."""
    try:
        info = pltpu.get_tpu_info()
        v = getattr(info, "vmem_capacity_bytes", None)
        if v:
            return int(v)
    except Exception:
        pass
    return 64 << 20  # v7x-sized fallback; v5e/v6e actually have 128 MiB


def _padded_vmem_footprint(block_b, G, E, H):
    """Double-buffered VMEM footprint with lane/sublane padding accounted for."""
    bb = _round_up(block_b, 8)
    x_t = bb * _round_up(G, 8) * _round_up(E, 128) * 4
    sig_t = bb * _round_up(H, 128) * 4
    out_t = bb * _round_up(G, 128) * 4
    w_t = _round_up(E, 8) * _round_up(H, 128) * 4
    bias_t = 8 * 128 * 4
    # Every BlockSpec is double-buffered by default, including the resident
    # W/bias (constant index_map => no re-DMA, but two buffers are reserved).
    # TODO(synk): on v7x try pipeline_mode=pl.Buffered(1) on W/bias to reclaim
    # the second resident buffer once confirmed supported for inputs.
    return 2 * (x_t + sig_t + out_t + w_t + bias_t)


def _auto_block_b(B, G, E, H, vmem_cap):
    # Padded x bytes per batch row as it actually sits in VMEM.
    row_bytes = _round_up(G, 8) * _round_up(E, 128) * 4
    # Target multi-MiB x tiles so the ~0.35us/step overhead is <~10%.
    target_tile = (8 << 20) if vmem_cap >= (64 << 20) else (4 << 20)
    bb = max(8, target_tile // row_bytes)
    if bb >= 256:
        bb = (bb // 256) * 256          # MXU-friendly M on v6e/v7x
    else:
        bb = _round_up(bb, 8)           # sublane alignment
    if B <= 8:
        bb = B                          # block == full batch (layout rule: equal dims)
    else:
        bb = min(bb, max(8, (B // 8) * 8))
        # Keep >= 8 grid steps on big batches so ("parallel",) gives each of
        # v7x's two TensorCores several tiles -- but only if tiles stay >=~1MiB.
        min_rows = max(8, (1 << 20) // row_bytes)
        if B >= 8 * min_rows:
            bb = min(bb, _round_up(pl.cdiv(B, 8), 8))
    # Shrink until the padded, double-buffered footprint fits the scoped cap.
    while _padded_vmem_footprint(bb, G, E, H) > vmem_cap and bb > 8:
        bb = max(8, _round_up(bb // 2, 8))
    return bb


def receiver_kernel(signal_ref, w_ref, b_ref, x_ref, out_ref):
    # Linear: h[b, e] = sum_h signal[b, h] * W[e, h] + bias[e]   (MXU, f32 accum)
    # W is consumed as [E, H] directly (contract on H) -- no wrapper transpose.
    h = lax.dot_general(
        signal_ref[...], w_ref[...],
        dimension_numbers=(((1,), (1,)), ((), ())),
        preferred_element_type=jnp.float32,
    ) + b_ref[...]                                                  # [TB, E]

    # Batched matvec: scores[b, g] = sum_e x[b, g, e] * h[b, e].
    # Statically unrolled over the small game dimension: each term is a
    # [TB, E] elementwise multiply + lane reduce against h directly, so h is
    # never broadcast/materialized as a [TB, G, E] VMEM temp.
    # TODO(synk): for E >= 128 route this reduction through the MXU (frees the
    # XLU); for large G compute scores transposed (G, TB) so the softmax and
    # the output store are lane-dense.
    G = x_ref.shape[1]
    cols = [
        jnp.sum(x_ref[:, g, :] * h, axis=-1, keepdims=True)         # [TB, 1]
        for g in range(G)
    ]
    scores = jnp.concatenate(cols, axis=-1)                          # [TB, G]

    # log_softmax over the game dimension (PyTorch dim=1), max-shifted.
    # NOTE: rows beyond the real batch in a ragged last block hold arbitrary
    # data and may produce inf/NaN here; that is benign -- log_softmax is
    # per-row and Pallas never writes those rows back to the (B, G) output.
    m = jnp.max(scores, axis=1, keepdims=True)                       # [TB, 1]
    shifted = scores - m
    lse = jnp.log(jnp.sum(jnp.exp(shifted), axis=1, keepdims=True))
    out_ref[...] = (shifted - lse).astype(out_ref.dtype)


def receiver_forward(signal, w, b, x, *, block_b=None):
    """signal: [B, H], w: [E, H] (PyTorch Linear weight), b: [E], x: [B, G, E]."""
    B, H = signal.shape
    E = w.shape[0]
    G = x.shape[1]

    # Generation-aware scoped-VMEM ceiling: ~48 MiB on v7x (64 MiB physical),
    # ~96 MiB on v5e/v6e (128 MiB physical; v5e's 16 MiB default would
    # otherwise be the first thing capping block_b).
    phys = _physical_vmem_bytes()
    vmem_cap = min(phys * 3 // 4, 96 << 20)

    if block_b is None:
        block_b = _auto_block_b(B, G, E, H, vmem_cap)
    else:
        block_b = B if B <= 8 else min(_round_up(block_b, 8), max(8, (B // 8) * 8))
        while _padded_vmem_footprint(block_b, G, E, H) > vmem_cap and block_b > 8:
            block_b = max(8, _round_up(block_b // 2, 8))

    grid = (pl.cdiv(B, block_b),)  # ragged last block handled in-grid; no jnp.pad

    footprint = _padded_vmem_footprint(block_b, G, E, H)
    vmem_limit = int(min(max(footprint + (2 << 20), 4 << 20), vmem_cap))

    b2d = b.reshape(1, E)  # keep bias 2-D for VMEM layout

    cost = pl.CostEstimate(
        flops=2 * B * H * E + 2 * B * G * E,
        transcendentals=B * G,                                       # exp in softmax
        bytes_accessed=4 * (B * H + E * H + E + B * G * E + B * G),
    )

    # TODO(synk): optionally stream x (and W) as bf16 and upcast in-kernel for
    # ~2x on the mem-bound x stream (gated on accuracy); if xprof still shows
    # exposed DMA on x after enlarging block_b, try pipeline_mode=pl.Buffered(3)
    # on the x BlockSpec (re-check VMEM with 3 buffers on v7x).
    out = pl.pallas_call(
        receiver_kernel,
        out_shape=jax.ShapeDtypeStruct((B, G), jnp.float32),
        grid_spec=pltpu.PrefetchScalarGridSpec(
            num_scalar_prefetch=0,
            grid=grid,
            in_specs=[
                pl.BlockSpec((block_b, H), lambda i: (i, 0)),        # signal (streamed)
                pl.BlockSpec((E, H), lambda i: (0, 0)),              # W (resident)
                pl.BlockSpec((1, E), lambda i: (0, 0)),              # bias (resident)
                pl.BlockSpec((block_b, G, E), lambda i: (i, 0, 0)),  # x (streamed, dominant)
            ],
            out_specs=pl.BlockSpec((block_b, G), lambda i: (i, 0)),
        ),
        compiler_params=pltpu.CompilerParams(
            dimension_semantics=("parallel",),
            vmem_limit_bytes=vmem_limit,
        ),
        cost_estimate=cost,
    )(signal, w, b2d, x)

    return out


def reference_forward(signal, w, b, x):
    h = signal @ w.T + b                          # [B, E]
    scores = jnp.einsum("bge,be->bg", x, h)       # [B, G]
    return jax.nn.log_softmax(scores, axis=1)


if __name__ == "__main__":
    # Small shapes implied by the module: batch=2, hidden=32, embedding=32, game_size=8
    B, H, E, G = 2, 32, 32, 8

    key = jax.random.PRNGKey(0)
    k_sig, k_x, k_w, k_b = jax.random.split(key, 4)

    signal = jax.random.normal(k_sig, (B, H), dtype=jnp.float32)
    x = jax.random.normal(k_x, (B, G, E), dtype=jnp.float32)
    # Deterministic parameter init (synthetic; shapes from nn.Linear(hidden, embedding))
    w = jax.random.normal(k_w, (E, H), dtype=jnp.float32) * 0.1
    b = jax.random.normal(k_b, (E,), dtype=jnp.float32) * 0.1

    out = receiver_forward(signal, w, b, x)
    jax.block_until_ready(out)
    ref = reference_forward(signal, w, b, x)
    assert out.shape == (B, G)
    assert jnp.allclose(out, ref, atol=1e-5, rtol=1e-5), "mismatch vs reference"

    # Multi-tile grid (pipelined x stream), batch divisible by the tile.
    B2 = 48
    k2 = jax.random.PRNGKey(1)
    k_sig2, k_x2 = jax.random.split(k2)
    signal2 = jax.random.normal(k_sig2, (B2, H), dtype=jnp.float32)
    x2 = jax.random.normal(k_x2, (B2, G, E), dtype=jnp.float32)
    out2 = receiver_forward(signal2, w, b, x2, block_b=16)
    jax.block_until_ready(out2)
    ref2 = reference_forward(signal2, w, b, x2)
    assert out2.shape == (B2, G)
    assert jnp.allclose(out2, ref2, atol=1e-5, rtol=1e-5), "mismatch vs reference (tiled)"

    # Ragged last block (no wrapper-side padding): 40 % 16 != 0.
    B3 = 40
    k3 = jax.random.PRNGKey(2)
    k_sig3, k_x3 = jax.random.split(k3)
    signal3 = jax.random.normal(k_sig3, (B3, H), dtype=jnp.float32)
    x3 = jax.random.normal(k_x3, (B3, G, E), dtype=jnp.float32)
    out3 = receiver_forward(signal3, w, b, x3, block_b=16)
    jax.block_until_ready(out3)
    ref3 = reference_forward(signal3, w, b, x3)
    assert out3.shape == (B3, G)
    assert jnp.allclose(out3, ref3, atol=1e-5, rtol=1e-5), "mismatch vs reference (ragged)"

    print("KERNEL_OK")
</pallas_src>

<mosaic_0001>
module attributes {stable_mosaic.version = 11 : i64} {
  func.func @receiver_kernel(%arg0: i32, %arg1: memref<2x32xf32, #tpu.memory_space<vmem>>, %arg2: memref<32x32xf32, #tpu.memory_space<vmem>>, %arg3: memref<1x32xf32, #tpu.memory_space<vmem>>, %arg4: memref<2x8x32xf32, #tpu.memory_space<vmem>>, %arg5: memref<2x8xf32, #tpu.memory_space<vmem>>) attributes {dimension_semantics = [#tpu.dimension_semantics<parallel>], iteration_bounds = array<i64: 1>, scalar_prefetch = 0 : i64, scratch_operands = 0 : i64, tpu.core_type = #tpu.core_type<tc>, window_params = [{transform_indices = @transform_0, window_bounds = array<i64: 2, 32>}, {pipeline_mode = #tpu.pipeline_mode<synchronous>, transform_indices = @transform_1, window_bounds = array<i64: 32, 32>}, {pipeline_mode = #tpu.pipeline_mode<synchronous>, transform_indices = @transform_2, window_bounds = array<i64: 1, 32>}, {transform_indices = @transform_3, window_bounds = array<i64: 2, 8, 32>}, {transform_indices = @transform_4, window_bounds = array<i64: 2, 8>}]} {
    %c0 = arith.constant 0 : index
    %c0_0 = arith.constant 0 : index
    %0 = vector.load %arg1[%c0, %c0_0] : memref<2x32xf32, #tpu.memory_space<vmem>>, vector<2x32xf32>
    %c0_1 = arith.constant 0 : index
    %c0_2 = arith.constant 0 : index
    %1 = vector.load %arg2[%c0_1, %c0_2] : memref<32x32xf32, #tpu.memory_space<vmem>>, vector<32x32xf32>
    %cst = arith.constant dense<0.000000e+00> : vector<2x32xf32>
    %2 = tpu.matmul %0, %1, %cst {dimension_numbers = #tpu.dot_dimension_numbers<[1], [1], [0], [0], [0, 0, 1, 0], [], []>} : vector<2x32xf32>, vector<32x32xf32>, vector<2x32xf32> -> vector<2x32xf32>
    %c0_3 = arith.constant 0 : index
    %c0_4 = arith.constant 0 : index
    %3 = vector.load %arg3[%c0_3, %c0_4] : memref<1x32xf32, #tpu.memory_space<vmem>>, vector<1x32xf32>
    %4 = vector.broadcast %3 : vector<1x32xf32> to vector<2x32xf32>
    %5 = arith.addf %2, %4 : vector<2x32xf32>
    %c0_5 = arith.constant 0 : index
    %c0_6 = arith.constant 0 : index
    %c0_7 = arith.constant 0 : index
    %6 = vector.load %arg4[%c0_5, %c0_6, %c0_7] : memref<2x8x32xf32, #tpu.memory_space<vmem>>, vector<2x1x32xf32>
    %7 = vector.shape_cast %6 : vector<2x1x32xf32> to vector<2x32xf32>
    %8 = arith.mulf %7, %5 : vector<2x32xf32>
    %cst_8 = arith.constant dense<0.000000e+00> : vector<2xf32>
    %9 = vector.multi_reduction <add>, %8, %cst_8 [1] : vector<2x32xf32> to vector<2xf32>
    %10 = vector.shape_cast %9 : vector<2xf32> to vector<2x1xf32>
    %c0_9 = arith.constant 0 : index
    %c1 = arith.constant 1 : index
    %c0_10 = arith.constant 0 : index
    %11 = vector.load %arg4[%c0_9, %c1, %c0_10] : memref<2x8x32xf32, #tpu.memory_space<vmem>>, vector<2x1x32xf32>
    %12 = vector.shape_cast %11 : vector<2x1x32xf32> to vector<2x32xf32>
    %13 = arith.mulf %12, %5 : vector<2x32xf32>
    %cst_11 = arith.constant dense<0.000000e+00> : vector<2xf32>
    %14 = vector.multi_reduction <add>, %13, %cst_11 [1] : vector<2x32xf32> to vector<2xf32>
    %15 = vector.shape_cast %14 : vector<2xf32> to vector<2x1xf32>
    %c0_12 = arith.constant 0 : index
    %c2 = arith.constant 2 : index
    %c0_13 = arith.constant 0 : index
    %16 = vector.load %arg4[%c0_12, %c2, %c0_13] : memref<2x8x32xf32, #tpu.memory_space<vmem>>, vector<2x1x32xf32>
    %17 = vector.shape_cast %16 : vector<2x1x32xf32> to vector<2x32xf32>
    %18 = arith.mulf %17, %5 : vector<2x32xf32>
    %cst_14 = arith.constant dense<0.000000e+00> : vector<2xf32>
    %19 = vector.multi_reduction <add>, %18, %cst_14 [1] : vector<2x32xf32> to vector<2xf32>
    %20 = vector.shape_cast %19 : vector<2xf32> to vector<2x1xf32>
    %c0_15 = arith.constant 0 : index
    %c3 = arith.constant 3 : index
    %c0_16 = arith.constant 0 : index
    %21 = vector.load %arg4[%c0_15, %c3, %c0_16] : memref<2x8x32xf32, #tpu.memory_space<vmem>>, vector<2x1x32xf32>
    %22 = vector.shape_cast %21 : vector<2x1x32xf32> to vector<2x32xf32>
    %23 = arith.mulf %22, %5 : vector<2x32xf32>
    %cst_17 = arith.constant dense<0.000000e+00> : vector<2xf32>
    %24 = vector.multi_reduction <add>, %23, %cst_17 [1] : vector<2x32xf32> to vector<2xf32>
    %25 = vector.shape_cast %24 : vector<2xf32> to vector<2x1xf32>
    %c0_18 = arith.constant 0 : index
    %c4 = arith.constant 4 : index
    %c0_19 = arith.constant 0 : index
    %26 = vector.load %arg4[%c0_18, %c4, %c0_19] : memref<2x8x32xf32, #tpu.memory_space<vmem>>, vector<2x1x32xf32>
    %27 = vector.shape_cast %26 : vector<2x1x32xf32> to vector<2x32xf32>
    %28 = arith.mulf %27, %5 : vector<2x32xf32>
    %cst_20 = arith.constant dense<0.000000e+00> : vector<2xf32>
    %29 = vector.multi_reduction <add>, %28, %cst_20 [1] : vector<2x32xf32> to vector<2xf32>
    %30 = vector.shape_cast %29 : vector<2xf32> to vector<2x1xf32>
    %c0_21 = arith.constant 0 : index
    %c5 = arith.constant 5 : index
    %c0_22 = arith.constant 0 : index
    %31 = vector.load %arg4[%c0_21, %c5, %c0_22] : memref<2x8x32xf32, #tpu.memory_space<vmem>>, vector<2x1x32xf32>
    %32 = vector.shape_cast %31 : vector<2x1x32xf32> to vector<2x32xf32>
    %33 = arith.mulf %32, %5 : vector<2x32xf32>
    %cst_23 = arith.constant dense<0.000000e+00> : vector<2xf32>
    %34 = vector.multi_reduction <add>, %33, %cst_23 [1] : vector<2x32xf32> to vector<2xf32>
    %35 = vector.shape_cast %34 : vector<2xf32> to vector<2x1xf32>
    %c0_24 = arith.constant 0 : index
    %c6 = arith.constant 6 : index
    %c0_25 = arith.constant 0 : index
    %36 = vector.load %arg4[%c0_24, %c6, %c0_25] : memref<2x8x32xf32, #tpu.memory_space<vmem>>, vector<2x1x32xf32>
    %37 = vector.shape_cast %36 : vector<2x1x32xf32> to vector<2x32xf32>
    %38 = arith.mulf %37, %5 : vector<2x32xf32>
    %cst_26 = arith.constant dense<0.000000e+00> : vector<2xf32>
    %39 = vector.multi_reduction <add>, %38, %cst_26 [1] : vector<2x32xf32> to vector<2xf32>
    %40 = vector.shape_cast %39 : vector<2xf32> to vector<2x1xf32>
    %c0_27 = arith.constant 0 : index
    %c7 = arith.constant 7 : index
    %c0_28 = arith.constant 0 : index
    %41 = vector.load %arg4[%c0_27, %c7, %c0_28] : memref<2x8x32xf32, #tpu.memory_space<vmem>>, vector<2x1x32xf32>
    %42 = vector.shape_cast %41 : vector<2x1x32xf32> to vector<2x32xf32>
    %43 = arith.mulf %42, %5 : vector<2x32xf32>
    %cst_29 = arith.constant dense<0.000000e+00> : vector<2xf32>
    %44 = vector.multi_reduction <add>, %43, %cst_29 [1] : vector<2x32xf32> to vector<2xf32>
    %45 = vector.shape_cast %44 : vector<2xf32> to vector<2x1xf32>
    %46 = tpu.concatenate %10, %15, %20, %25, %30, %35, %40, %45 in 1 : vector<2x1xf32>, vector<2x1xf32>, vector<2x1xf32>, vector<2x1xf32>, vector<2x1xf32>, vector<2x1xf32>, vector<2x1xf32>, vector<2x1xf32> -> vector<2x8xf32>
    %cst_30 = arith.constant dense<0xFF800000> : vector<2xf32>
    %47 = vector.multi_reduction <maximumf>, %46, %cst_30 [1] : vector<2x8xf32> to vector<2xf32>
    %48 = vector.shape_cast %47 : vector<2xf32> to vector<2x1xf32>
    %49 = vector.broadcast %48 : vector<2x1xf32> to vector<2x8xf32>
    %50 = arith.subf %46, %49 : vector<2x8xf32>
    %51 = math.exp %50 : vector<2x8xf32>
    %cst_31 = arith.constant dense<0.000000e+00> : vector<2xf32>
    %52 = vector.multi_reduction <add>, %51, %cst_31 [1] : vector<2x8xf32> to vector<2xf32>
    %53 = vector.shape_cast %52 : vector<2xf32> to vector<2x1xf32>
    %54 = math.log %53 : vector<2x1xf32>
    %55 = vector.broadcast %54 : vector<2x1xf32> to vector<2x8xf32>
    %56 = arith.subf %50, %55 : vector<2x8xf32>
    %c0_32 = arith.constant 0 : index
    %c0_33 = arith.constant 0 : index
    %57 = vector.load %arg5[%c0_32, %c0_33] : memref<2x8xf32, #tpu.memory_space<vmem>>, vector<2x8xf32>
    tpu.vector_store %arg5[%c0_32, %c0_33], %56 {strides = array<i32>} : memref<2x8xf32, #tpu.memory_space<vmem>>, vector<2x8xf32>,
    return
  }
  func.func @transform_0(%arg0: i32) -> (i32, i32) {
    %c0_i32 = arith.constant 0 : i32
    %c0_i32_0 = arith.constant 0 : i32
    return %arg0, %c0_i32 : i32, i32
  }
  func.func @transform_1(%arg0: i32) -> (i32, i32) {
    %c0_i32 = arith.constant 0 : i32
    %c0_i32_0 = arith.constant 0 : i32
    %c0_i32_1 = arith.constant 0 : i32
    return %c0_i32, %c0_i32_0 : i32, i32
  }
  func.func @transform_2(%arg0: i32) -> (i32, i32) {
    %c0_i32 = arith.constant 0 : i32
    %c0_i32_0 = arith.constant 0 : i32
    %c0_i32_1 = arith.constant 0 : i32
    return %c0_i32, %c0_i32_0 : i32, i32
  }
  func.func @transform_3(%arg0: i32) -> (i32, i32, i32) {
    %c0_i32 = arith.constant 0 : i32
    %c0_i32_0 = arith.constant 0 : i32
    %c0_i32_1 = arith.constant 0 : i32
    return %arg0, %c0_i32, %c0_i32_0 : i32, i32, i32
  }
  func.func @transform_4(%arg0: i32) -> (i32, i32) {
    %c0_i32 = arith.constant 0 : i32
    %c0_i32_0 = arith.constant 0 : i32
    return %arg0, %c0_i32 : i32, i32
  }
}

</mosaic_0001>

<bundles_post_ra>
// kernel: tpu_custom_call.1
= control target key start
LH: loop header
LB: loop body
LE: loop exit
PB: predicated region body
PF: predicated region fallthrough
CT: control target
= control target key end

     0   :  { %9 = vsyncpa [#allocation3], 0  ;;  %s548_s0 = inlined_call_operand.hbm [shape: f32[2,32], index: 0, kind: input, shape index: {}]   ;;  %s549_s1 = inlined_call_operand.hbm [shape: f32[32,32], index: 1, kind: input, shape index: {}]   ;;  %s550_s2 = inlined_call_operand.vmem [shape: f32[1,32], index: 2, kind: input, shape index: {}]   ;;  %s551_s3 = inlined_call_operand.hbm [shape: f32[2,8,32], index: 3, kind: input, shape index: {}]   ;;  %s552_s4 = inlined_call_operand.hbm [shape: f32[2,8], index: 4, kind: output, shape index: {}]  }
   0x1   :  { %10 = vsyncpa [#allocation6], 0 }
   0x2   :  { %11 = vsyncpa [#allocation4], 0  ;;  %s438_s15 = smov [#allocation5]   ;;  %s344_s19 = scalar_lea.hbm %s549_s1, 512 }
   0x3   :  { %s27_s16 = sshll.u32 %s438_s15, 4  ;;  %p345_p0 = scmp.ne.s32.totalorder %s549_s1, %s344_s19  ;;  %s28_s16 = int_to_ptr.vmem [resolvable:$true] %s27_s16 }
   0x4   :  { %p348_p1 = scmp.lt.u32.totalorder %s344_s19, %s549_s1 }
   0x6   :  { %p350_p2 = pnand %p348_p1, %p345_p0 }
   0x8   :  { %353 = shalt.err (!%p350_p2)
}
   0x9   :  { %s354_s24 = scalar_lea.vmem %s28_s16, 512  ;;  %p359_p4 = scmp.lt.s32.totalorder %s28_s16, %s28_s16 }
   0xa   :  { %p355_p3 = scmp.ne.s32.totalorder %s28_s16, %s354_s24  ;;  %p360_p5 = scmp.lt.s32.totalorder %s354_s24, %s354_s24 }
   0xc   :  { %p361_p6 = por %p360_p5, %p359_p4 }
   0xe   :  { %p362_p7 = pnand %p361_p6, %p355_p3 }
  0x10   :  { %365 = shalt.err (!%p362_p7)
}
  0x11   :  { %s439_s25 = smov 128   ;;  %s440_s26 = smov 8  }
  0x12   :  { %33 = dma.hbm_to_vmem [thread:$0]  %s549_s1, 512, %s28_s16, [#allocation6], %s439_s25, %s439_s25, %s440_s26  }
  0x13   :  { %s441_s29 = smov [#allocation2]   ;;  %s442_s5 = smov [#allocation7]  }
  0x14   :  { %s18_s30 = sshll.u32 %s441_s29, 4  ;;  %s41_s6 = sshll.u32 %s442_s5, 4  ;;  %s19_s30 = int_to_ptr.vmem [resolvable:$true] %s18_s30  ;;  %s42_s6 = int_to_ptr.vmem [resolvable:$true] %s41_s6 }
  0x15   :  { %s366_s9 = scalar_lea.hbm %s548_s0, 32 }
  0x16   :  { %p367_p8 = scmp.ne.s32.totalorder %s548_s0, %s366_s9  ;;  %p370_p9 = scmp.lt.u32.totalorder %s366_s9, %s548_s0 }
  0x18   :  { %p372_p10 = pnand %p370_p9, %p367_p8 }
  0x1a   :  { %375 = shalt.err (!%p372_p10)
}
  0x1b   :  { %s376_s1 = scalar_lea.vmem %s19_s30, 32  ;;  %p381_p12 = scmp.lt.s32.totalorder %s19_s30, %s19_s30 }
  0x1c   :  { %p377_p11 = scmp.ne.s32.totalorder %s19_s30, %s376_s1  ;;  %p382_p13 = scmp.lt.s32.totalorder %s376_s1, %s376_s1 }
  0x1e   :  { %p383_p0 = por %p382_p13, %p381_p12 }
  0x20   :  { %p384_p1 = pnand %p383_p0, %p377_p11 }
  0x22   :  { %387 = shalt.err (!%p384_p1)
}
  0x23   :  { %21 = dma.hbm_to_vmem [thread:$0]  %s548_s0, 32, %s19_s30, [#allocation3]  }
  0x24   :  { %s388_s18 = scalar_lea.hbm %s551_s3, 256 }
  0x25   :  { %p389_p2 = scmp.ne.s32.totalorder %s551_s3, %s388_s18  ;;  %p392_p3 = scmp.lt.u32.totalorder %s388_s18, %s551_s3 }
  0x27   :  { %p394_p4 = pnand %p392_p3, %p389_p2 }
  0x29   :  { %397 = shalt.err (!%p394_p4)
}
  0x2a   :  { %s398_s23 = scalar_lea.vmem %s42_s6, 256  ;;  %p403_p6 = scmp.lt.s32.totalorder %s42_s6, %s42_s6 }
  0x2b   :  { %p399_p5 = scmp.ne.s32.totalorder %s42_s6, %s398_s23  ;;  %p404_p7 = scmp.lt.s32.totalorder %s398_s23, %s398_s23 }
  0x2d   :  { %p405_p8 = por %p404_p7, %p403_p6 }
  0x2f   :  { %p406_p9 = pnand %p405_p8, %p399_p5 }
  0x31   :  { %409 = shalt.err (!%p406_p9)
}
  0x32   :  { %47 = dma.hbm_to_vmem [thread:$0]  %s551_s3, 256, %s42_s6, [#allocation6], %s439_s25, %s439_s25, %s440_s26  }
  0x33   :  { %432 = dma.done.wait [#allocation3], 32  }
  0x34   :  { %433 = vsyncadd [#allocation3], 4294967264 }
  0x35   :  { %434 = dma.done.wait [#allocation6], 768  }
  0x36   :  { %435 = vsyncadd [#allocation6], 4294966528  ;;  %v443_v0 = vmov 0.0|0.0   ;;  %vm444_vm0 = vmmov 0   ;;  %v445_v1 = vmov 0.0   ;;  %vm69_vm1 = vcmask 261120  }
  0x37   :  { %323 = vmatprep.subr.bf16.mxu0 %v443_v0  ;;  %320 = vmatprep.mubr.msk.f32.mxu0 %vm444_vm0, %v445_v1  ;;  %v58_v2 = vld [vmem:[#allocation5] sm:$0xff]  ;;  %v59_v3 = vld [vmem:[#allocation5 + $0x8] sm:$0xff]  ;;  %vm325_vm2 = vmpackc.low %vm69_vm1, %vm69_vm1  ;;  %vm166_vm3 = vcmask 1041409   ;;  %vm169_vm4 = vcmask 254976   ;;  %vm257_vm5 = vcmask 7168   ;;  %vm259_vm6 = vcmask 15360  }
  0x38   :  { %v324_v4 = vpack.c.bf16 %v59_v3, %v58_v2  ;;  %v60_v5 = vld [vmem:[#allocation5 + $0x10] sm:$0xff]  ;;  %v61_v6 = vld [vmem:[#allocation5 + $0x18] sm:$0xff]  ;;  %v185_v13 = vld [vmem:[#allocation7 + $0x2] sm:$0x1]  ;;  %vm261_vm7 = vcmask 23552   ;;  %vm263_vm8 = vcmask 31744  }
  0x39   :  { %v328_v7 = vpack.c.bf16 %v61_v6, %v60_v5  ;;  %v57_v8 = vld [vmem:[#allocation2] sm:$0x3]  ;;  %v186_v14 = vld [vmem:[#allocation7 + $0xa] sm:$0x1]  ;;  %v155_v15 = vld [vmem:[#allocation7] sm:$0x1] }
  0x3a   :  { %326 = vmatpush3.bf16.xpose.msk.msra.mxu0 %vm325_vm2, %v324_v4  ;;  %v301_v9 = vld [vmem:[%s550_s2] ss:$0 sm:$0xff]  ;;  %v156_v16 = vld [vmem:[#allocation7 + $0x8] sm:$0x1]  ;;  %v198_v17 = vld [vmem:[#allocation7 + $0xb] sm:$0x1] }
  0x3b   :  { %327 = vmatprep.subr.bf16.mxu0 %v443_v0  ;;  %v174_v18 = vld [vmem:[#allocation7 + $0x9] sm:$0x1]  ;;  %v222_v20 = vld [vmem:[#allocation7 + $0xd] sm:$0x1]  ;;  %v210_v21 = vld [vmem:[#allocation7 + $0xc] sm:$0x1] }
  0x3c   :  { %v197_v28 = vld [vmem:[#allocation7 + $0x3] sm:$0x1]  ;;  %v173_v29 = vld [vmem:[#allocation7 + $0x1] sm:$0x1]  ;;  %v246_v36 = vld [vmem:[#allocation7 + $0xf] sm:$0x1] }
  0x3d   :  { %v234_v37 = vld [vmem:[#allocation7 + $0xe] sm:$0x1]  ;;  %v221_v42 = vld [vmem:[#allocation7 + $0x5] sm:$0x1]  ;;  %v209_v46 = vld [vmem:[#allocation7 + $0x4] sm:$0x1] }
  0x3e   :  { %v245_v56 = vld [vmem:[#allocation7 + $0x7] sm:$0x1]  ;;  %v233_v57 = vld [vmem:[#allocation7 + $0x6] sm:$0x1]  ;;  %vm265_vm9 = vcmask 39936   ;;  %vm267_vm10 = vcmask 48128  }
  0x3f   :  { %vm269_vm11 = vcmask 56320   ;;  %vm271_vm12 = vcmask 58368   ;;  %s446_s2 = smov [#allocation8]  }
  0x40   :  { %s291_s26 = sshll.u32 %s446_s2, 4  ;;  %s292_s26 = int_to_ptr.vmem [resolvable:$true] %s291_s26 }
  0x41   :  { %s410_s27 = scalar_lea.vmem %s292_s26, 32  ;;  %p415_p11 = scmp.lt.s32.totalorder %s292_s26, %s292_s26 }
  0x42   :  { %330 = vmatpush3.bf16.xpose.msk.msra.mxu0 %vm325_vm2, %v328_v7  ;;  %p411_p10 = scmp.ne.s32.totalorder %s292_s26, %s410_s27  ;;  %p416_p12 = scmp.lt.s32.totalorder %s410_s27, %s410_s27 }
  0x44   :  { %p417_p13 = por %p416_p12, %p415_p11 }
  0x46   :  { %p418_p0 = pnand %p417_p13, %p411_p10 }
  0x49   :  { %321 = vmatmul.mubr.msk.f32.vlgmr.msra.gmra.mrb[0].mxu0 %vm69_vm1, %v57_v8 }
 0x11c   :  { %v151_v10 = vpop.f32.mrb[0].mxu0 }
 0x11d   :  { %v152_v11 = vadd.f32 %v301_v9, %v151_v10  ;;  %v322_v12 = vpop.f32.mrb[1].mxu0 }
 0x11f   :  { %v158_v19 = vrot.slane %v152_v11, 1  ;;  %v187_v26 = vmul.f32 %v185_v13, %v152_v11  ;;  %v161_v27 = vmul.f32 %v155_v15, %v152_v11  ;;  %v199_v40 = vmul.f32 %v197_v28, %v152_v11 }
 0x120   :  { %v175_v41 = vmul.f32 %v173_v29, %v152_v11  ;;  %v223_v52 = vmul.f32 %v221_v42, %v152_v11  ;;  %v211_v53 = vmul.f32 %v209_v46, %v152_v11  ;;  %v247_v62 = vmul.f32 %v245_v56, %v152_v11 }
 0x121   :  { %v188_v22 = vmul.f32 %v186_v14, %v158_v19  ;;  %v162_v23 = vmul.f32 %v158_v19, %v156_v16  ;;  %v200_v24 = vmul.f32 %v198_v17, %v158_v19  ;;  %v176_v25 = vmul.f32 %v174_v18, %v158_v19 }
 0x122   :  { %v224_v30 = vmul.f32 %v222_v20, %v158_v19  ;;  %v212_v31 = vmul.f32 %v210_v21, %v158_v19  ;;  %v248_v47 = vmul.f32 %v246_v36, %v158_v19  ;;  %v236_v51 = vmul.f32 %v234_v37, %v158_v19 }
 0x123   :  { %v191_v32 = vrot.slane %v188_v22, 7  ;;  %v165_v33 = vrot.slane %v162_v23, 7  ;;  %v203_v34 = vrot.slane %v200_v24, 7  ;;  %v179_v35 = vrot.slane %v176_v25, 7 }
 0x124   :  { %v227_v45 = vrot.slane %v224_v30, 7  ;;  %v215_v50 = vrot.slane %v212_v31, 7  ;;  %v251_v60 = vrot.slane %v248_v47, 7  ;;  %v239_v61 = vrot.slane %v236_v51, 7 }
 0x125   :  { %v192_v38 = vsel %vm166_vm3, %v191_v32, %v187_v26  ;;  %v167_v39 = vsel %vm166_vm3, %v165_v33, %v161_v27  ;;  %v204_v48 = vsel %vm166_vm3, %v203_v34, %v199_v40  ;;  %v180_v49 = vsel %vm166_vm3, %v179_v35, %v175_v41 }
 0x126   :  { %v194_v43 = vsel %vm169_vm4, %v192_v38, 0.0  ;;  %v170_v44 = vsel %vm169_vm4, %v167_v39, 0.0  ;;  %v206_v54 = vsel %vm169_vm4, %v204_v48, 0.0  ;;  %v182_v55 = vsel %vm169_vm4, %v180_v49, 0.0 }
 0x127   :  { %195 = vadd.xlane.f32.xlu1 %v194_v43  ;;  %171 = vadd.xlane.f32.xlu0 %v170_v44  ;;  %v228_v58 = vsel %vm166_vm3, %v227_v45, %v223_v52  ;;  %v216_v59 = vsel %vm166_vm3, %v215_v50, %v211_v53  ;;  %v235_v63 = vmul.f32 %v233_v57, %v152_v11 }
 0x128   :  { %v230_v0 = vsel %vm169_vm4, %v228_v58, 0.0  ;;  %v218_v1 = vsel %vm169_vm4, %v216_v59, 0.0  ;;  %v252_v2 = vsel %vm166_vm3, %v251_v60, %v247_v62 }
 0x129   :  { %v240_v3 = vsel %vm166_vm3, %v239_v61, %v235_v63  ;;  %v254_v4 = vsel %vm169_vm4, %v252_v2, 0.0 }
 0x12a   :  { %v242_v5 = vsel %vm169_vm4, %v240_v3, 0.0 }
 0x12b   :  { %207 = vadd.xlane.f32.xlu1 %v206_v54  ;;  %183 = vadd.xlane.f32.xlu0 %v182_v55 }
 0x12f   :  { %231 = vadd.xlane.f32.xlu1 %v230_v0  ;;  %219 = vadd.xlane.f32.xlu0 %v218_v1 }
 0x133   :  { %255 = vadd.xlane.f32.xlu1 %v254_v4  ;;  %243 = vadd.xlane.f32.xlu0 %v242_v5 }
 0x1b4   :  { %v196_v6 = vpop.xlane.xlu1 %195  ;;  %v172_v7 = vpop.xlane.xlu0 %171 }
 0x1b8   :  { %v208_v8 = vpop.xlane.xlu1 %207  ;;  %v184_v9 = vpop.xlane.xlu0 %183 }
 0x1b9   :  { %v258_v10 = vsel %vm257_vm5, %v172_v7, %v184_v9 }
 0x1ba   :  { %v260_v11 = vsel %vm259_vm6, %v258_v10, %v196_v6 }
 0x1bb   :  { %v262_v12 = vsel %vm261_vm7, %v260_v11, %v208_v8 }
 0x1bc   :  { %v232_v13 = vpop.xlane.xlu1 %231  ;;  %v220_v14 = vpop.xlane.xlu0 %219 }
 0x1bd   :  { %v264_v15 = vsel %vm263_vm8, %v262_v12, %v220_v14 }
 0x1be   :  { %v266_v17 = vsel %vm265_vm9, %v264_v15, %v232_v13 }
 0x1c0   :  { %v256_v16 = vpop.xlane.xlu1 %255  ;;  %v244_v18 = vpop.xlane.xlu0 %243 }
 0x1c1   :  { %v268_v19 = vsel %vm267_vm10, %v266_v17, %v244_v18 }
 0x1c2   :  { %v270_v20 = vsel %vm269_vm11, %v268_v19, %v256_v16 }
 0x1c3   :  { %v272_v21 = vsel %vm271_vm12, %v270_v20, -inf }
 0x1c4   :  { %273 = vmax.xlane.f32.xlu0 %v272_v21 }
 0x251   :  { %v274_v22 = vpop.xlane.xlu0 %273 }
 0x252   :  { %v275_v23 = vsub.f32 %v270_v20, %v274_v22 }
 0x254   :  { %v276_v24 = vmul.f32 1.442695, %v275_v23 }
 0x256   :  { %340 = vpow2.f32 %v276_v24 }
 0x260   :  { %v341_v25 = vpop.eup %340 }
 0x261   :  { %v278_v26 = vsel %vm271_vm12, %v341_v25, 0.0 }
 0x262   :  { %279 = vadd.xlane.f32.xlu1 %v278_v26 }
 0x2ef   :  { %v280_v27 = vpop.xlane.xlu1 %279 }
 0x2f0   :  { %342 = vlog2.f32 %v280_v27 }
 0x2fa   :  { %v343_v28 = vpop.eup %342 }
 0x2fb   :  { %v282_v29 = vmul.f32 0.6931472, %v343_v28 }
 0x2fd   :  { %v283_v30 = vsub.f32 %v275_v23, %v282_v29 }
 0x2ff   :  { %284 = vst.msk [vmem:[#allocation8] sm:$0x3] %vm271_vm12, %v283_v30 }
 0x300   :  { %421 = shalt.err (!%p418_p0)
}
 0x301   :  { %s422_s30 = scalar_lea.hbm %s552_s4, 32 }
 0x302   :  { %p423_p1 = scmp.ne.s32.totalorder %s552_s4, %s422_s30  ;;  %p426_p2 = scmp.lt.u32.totalorder %s422_s30, %s552_s4 }
 0x304   :  { %p428_p3 = pnand %p426_p2, %p423_p1 }
 0x306   :  { %431 = shalt.err (!%p428_p3)
}
 0x307   :  { %294 = dma.vmem_to_hbm [thread:$0]  %s292_s26, 32, %s552_s4, [#allocation4]  }
 0x308   :  { %436 = dma.done.wait [#allocation4], 32  }
 0x309   :  { %437 = vsyncadd [#allocation4], 4294967264 }
 0x30a   :  { %298 = vsyncpa [#allocation3], 1 }
 0x30b   :  { %299 = vsyncpa [#allocation6], 1 }
 0x30c   :  { %300 = vsyncpa [#allocation4], 1 }

</bundles_post_ra>
